<compile_context>
chip_gen: v7x
topology: tpu7x:2x2x1
jax: 0.10.0
libtpu: 0.0.40
codegen_flags: <defaults>
</compile_context>

<pallas_src>
import functools

import jax
import jax.numpy as jnp
from jax.experimental import pallas as pl
from jax.experimental.pallas import tpu as pltpu


# ---------------- fused FFN kernel ----------------
# One row-tile (TM, C) per grid step; both matmuls + ReLU fused, hidden dim
# processed in h_chunk-wide slices accumulated into a (TM, C) f32 accumulator.
def ffn_kernel(x_ref, w1_ref, b1_ref, w2_ref, b2_ref, o_ref, *, h_chunk):
    x = x_ref[...]                                    # (TM, C) bf16
    tm = x.shape[0]
    C = o_ref.shape[1]
    H = w1_ref.shape[1]
    n_chunks = H // h_chunk

    acc = jnp.zeros((tm, C), jnp.float32)
    for c in range(n_chunks):                         # static, lane-aligned slices
        s = c * h_chunk
        # Linear1 chunk + bias + ReLU (bf16 MXU inputs, f32 accumulate/VPU).
        h = jnp.dot(x, w1_ref[:, s:s + h_chunk],
                    preferred_element_type=jnp.float32)
        h = jnp.maximum(h + b1_ref[:, s:s + h_chunk], 0.0)   # (TM, h_chunk) f32
        # Linear2 chunk accumulated into the output accumulator.
        acc = acc + jnp.dot(h.astype(jnp.bfloat16), w2_ref[s:s + h_chunk, :],
                            preferred_element_type=jnp.float32)

    # TODO(synk): nn.Dropout(0.2) is identity in eval/deterministic forward.
    o_ref[...] = (acc + b2_ref[...]).astype(o_ref.dtype)      # (TM, C) bf16


def feed_forward(x, w1, b1, w2, b2, *, tm=None, h_chunk=512):
    """x: (B, T, C) float; w1: (C, H) bf16; b1: (1, H) f32; w2: (H, C) bf16; b2: (1, C) f32.

    Returns (B, T, C) bf16.
    """
    B, T, C = x.shape
    H = w1.shape[1]
    rows = B * T

    # Row tile: >=128 always; 256 when rows allow an even >=2-way grid split
    # (keeps both v7x TensorCores busy without starving the MXU M dim).
    if tm is None:
        if rows >= 512:
            tm = 256
        else:
            tm = 128

    # Hidden chunk: lane-aligned, divides H (H = 4*C with C a multiple of 128).
    h_chunk = min(h_chunk, H)
    if H % h_chunk != 0:
        h_chunk = H

    # bf16 activations on the wire; pad rows to a multiple of tm.
    x2 = x.reshape(rows, C).astype(jnp.bfloat16)
    n_tiles = pl.cdiv(rows, tm)
    rows_p = n_tiles * tm
    if rows_p != rows:
        x2 = jnp.pad(x2, ((0, rows_p - rows), (0, 0)))

    # VMEM budget: resident weights/biases + double-buffered bf16 x/out tiles
    # + in-kernel hidden scratch, with margin; clamped to physical limits.
    bytes_resident = (w1.size * w1.dtype.itemsize + w2.size * w2.dtype.itemsize
                      + b1.size * b1.dtype.itemsize + b2.size * b2.dtype.itemsize)
    bytes_stream = 2 * (tm * C * 2) + 2 * (tm * C * 2)        # x + out, 2 bufs each
    bytes_scratch = tm * h_chunk * (4 + 2) + tm * C * 4       # h f32 + h bf16 + acc
    vmem_limit = min(max(bytes_resident + bytes_stream + bytes_scratch + (4 << 20),
                         16 << 20), 64 << 20)

    kernel = functools.partial(ffn_kernel, h_chunk=h_chunk)

    out = pl.pallas_call(
        kernel,
        out_shape=jax.ShapeDtypeStruct((rows_p, C), jnp.bfloat16),
        grid=(n_tiles,),
        in_specs=[
            pl.BlockSpec((tm, C), lambda i: (i, 0)),                    # x row-tile
            pl.BlockSpec((C, H), lambda i: (0, 0),
                         pipeline_mode=pl.Buffered(1)),                 # w1 resident
            pl.BlockSpec((1, H), lambda i: (0, 0),
                         pipeline_mode=pl.Buffered(1)),                 # b1 resident
            pl.BlockSpec((H, C), lambda i: (0, 0),
                         pipeline_mode=pl.Buffered(1)),                 # w2 resident
            pl.BlockSpec((1, C), lambda i: (0, 0),
                         pipeline_mode=pl.Buffered(1)),                 # b2 resident
        ],
        out_specs=pl.BlockSpec((tm, C), lambda i: (i, 0)),
        compiler_params=pltpu.CompilerParams(
            dimension_semantics=("parallel",),
            vmem_limit_bytes=vmem_limit,
        ),
    )(x2, w1, b1, w2, b2)

    if rows_p != rows:
        out = out[:rows]
    return out.reshape(B, T, C)


if __name__ == "__main__":
    # Small shapes consistent with the module (n_embd scaled 384 -> 128,
    # hidden = 4 * n_embd); all lane dims are multiples of 128.
    B, T, C = 2, 64, 128
    H = 4 * C

    key = jax.random.PRNGKey(0)
    kx, k1, kb1, k2, kb2 = jax.random.split(key, 5)
    x = jax.random.normal(kx, (B, T, C), dtype=jnp.float32)

    # nn.Linear weights stored pre-transposed to (in, out); bf16 for the MXU.
    w1 = (0.02 * jax.random.normal(k1, (C, H))).astype(jnp.bfloat16)
    b1 = (0.02 * jax.random.normal(kb1, (1, H))).astype(jnp.float32)
    w2 = (0.02 * jax.random.normal(k2, (H, C))).astype(jnp.bfloat16)
    b2 = (0.02 * jax.random.normal(kb2, (1, C))).astype(jnp.float32)

    out = jax.block_until_ready(feed_forward(x, w1, b1, w2, b2))

    # Plain-JAX reference.  Note: the kernel quantizes activations to bf16 at
    # the HBM boundary (and outputs bf16); reference uses the same input
    # quantization and an f32 path, with a tolerance covering bf16 rounding.
    xq = x.astype(jnp.bfloat16).astype(jnp.float32).reshape(-1, C)
    ref = jnp.maximum(xq @ w1.astype(jnp.float32) + b1, 0.0)
    ref = (ref @ w2.astype(jnp.float32) + b2).reshape(B, T, C)

    assert out.shape == (B, T, C), out.shape
    assert out.dtype == jnp.bfloat16, out.dtype
    outf = out.astype(jnp.float32)
    assert bool(jnp.all(jnp.isfinite(outf)))
    max_err = float(jnp.max(jnp.abs(outf - ref)))
    assert max_err < 3e-2, max_err
    print("KERNEL_OK")
</pallas_src>

<mosaic_0001>
module attributes {stable_mosaic.version = 11 : i64} {
  func.func @ffn_kernel(%arg0: i32, %arg1: memref<128x128xbf16, #tpu.memory_space<vmem>>, %arg2: memref<128x512xbf16, #tpu.memory_space<vmem>>, %arg3: memref<1x512xf32, #tpu.memory_space<vmem>>, %arg4: memref<512x128xbf16, #tpu.memory_space<vmem>>, %arg5: memref<1x128xf32, #tpu.memory_space<vmem>>, %arg6: memref<128x128xbf16, #tpu.memory_space<vmem>>) attributes {dimension_semantics = [#tpu.dimension_semantics<parallel>], iteration_bounds = array<i64: 1>, scalar_prefetch = 0 : i64, scratch_operands = 0 : i64, tpu.core_type = #tpu.core_type<tc>, window_params = [{transform_indices = @transform_0, window_bounds = array<i64: 128, 128>}, {pipeline_mode = #tpu.pipeline_mode<synchronous>, transform_indices = @transform_1, window_bounds = array<i64: 128, 512>}, {pipeline_mode = #tpu.pipeline_mode<synchronous>, transform_indices = @transform_2, window_bounds = array<i64: 1, 512>}, {pipeline_mode = #tpu.pipeline_mode<synchronous>, transform_indices = @transform_3, window_bounds = array<i64: 512, 128>}, {pipeline_mode = #tpu.pipeline_mode<synchronous>, transform_indices = @transform_4, window_bounds = array<i64: 1, 128>}, {transform_indices = @transform_5, window_bounds = array<i64: 128, 128>}]} {
    %c0 = arith.constant 0 : index
    %c0_0 = arith.constant 0 : index
    %0 = vector.load %arg1[%c0, %c0_0] : memref<128x128xbf16, #tpu.memory_space<vmem>>, vector<128x128xbf16>
    %cst = arith.constant 0.000000e+00 : f32
    %1 = vector.broadcast %cst : f32 to vector<128x128xf32>
    %c0_1 = arith.constant 0 : index
    %c0_2 = arith.constant 0 : index
    %2 = vector.load %arg2[%c0_1, %c0_2] : memref<128x512xbf16, #tpu.memory_space<vmem>>, vector<128x512xbf16>
    %cst_3 = arith.constant dense<0.000000e+00> : vector<128x512xf32>
    %3 = tpu.matmul %0, %2, %cst_3 {dimension_numbers = #tpu.dot_dimension_numbers<[1], [0], [0], [1], [0, 0, 1, 1], [], []>} : vector<128x128xbf16>, vector<128x512xbf16>, vector<128x512xf32> -> vector<128x512xf32>
    %c0_4 = arith.constant 0 : index
    %c0_5 = arith.constant 0 : index
    %4 = vector.load %arg3[%c0_4, %c0_5] : memref<1x512xf32, #tpu.memory_space<vmem>>, vector<1x512xf32>
    %5 = vector.broadcast %4 : vector<1x512xf32> to vector<128x512xf32>
    %6 = arith.addf %3, %5 : vector<128x512xf32>
    %cst_6 = arith.constant 0.000000e+00 : f32
    %7 = vector.broadcast %cst_6 : f32 to vector<128x512xf32>
    %8 = arith.maximumf %6, %7 : vector<128x512xf32>
    %9 = arith.truncf %8 : vector<128x512xf32> to vector<128x512xbf16>
    %c0_7 = arith.constant 0 : index
    %c0_8 = arith.constant 0 : index
    %10 = vector.load %arg4[%c0_7, %c0_8] : memref<512x128xbf16, #tpu.memory_space<vmem>>, vector<512x128xbf16>
    %cst_9 = arith.constant dense<0.000000e+00> : vector<128x128xf32>
    %11 = tpu.matmul %9, %10, %cst_9 {dimension_numbers = #tpu.dot_dimension_numbers<[1], [0], [0], [1], [0, 0, 1, 1], [], []>} : vector<128x512xbf16>, vector<512x128xbf16>, vector<128x128xf32> -> vector<128x128xf32>
    %12 = arith.addf %1, %11 : vector<128x128xf32>
    %c0_10 = arith.constant 0 : index
    %c0_11 = arith.constant 0 : index
    %13 = vector.load %arg5[%c0_10, %c0_11] : memref<1x128xf32, #tpu.memory_space<vmem>>, vector<1x128xf32>
    %14 = vector.broadcast %13 : vector<1x128xf32> to vector<128x128xf32>
    %15 = arith.addf %12, %14 : vector<128x128xf32>
    %16 = arith.truncf %15 : vector<128x128xf32> to vector<128x128xbf16>
    %c0_12 = arith.constant 0 : index
    %c0_13 = arith.constant 0 : index
    %17 = vector.load %arg6[%c0_12, %c0_13] : memref<128x128xbf16, #tpu.memory_space<vmem>>, vector<128x128xbf16>
    tpu.vector_store %arg6[%c0_12, %c0_13], %16 {strides = array<i32>} : memref<128x128xbf16, #tpu.memory_space<vmem>>, vector<128x128xbf16>,
    return
  }
  func.func @transform_0(%arg0: i32) -> (i32, i32) {
    %c0_i32 = arith.constant 0 : i32
    %c0_i32_0 = arith.constant 0 : i32
    return %arg0, %c0_i32 : i32, i32
  }
  func.func @transform_1(%arg0: i32) -> (i32, i32) {
    %c0_i32 = arith.constant 0 : i32
    %c0_i32_0 = arith.constant 0 : i32
    %c0_i32_1 = arith.constant 0 : i32
    return %c0_i32, %c0_i32_0 : i32, i32
  }
  func.func @transform_2(%arg0: i32) -> (i32, i32) {
    %c0_i32 = arith.constant 0 : i32
    %c0_i32_0 = arith.constant 0 : i32
    %c0_i32_1 = arith.constant 0 : i32
    return %c0_i32, %c0_i32_0 : i32, i32
  }
  func.func @transform_3(%arg0: i32) -> (i32, i32) {
    %c0_i32 = arith.constant 0 : i32
    %c0_i32_0 = arith.constant 0 : i32
    %c0_i32_1 = arith.constant 0 : i32
    return %c0_i32, %c0_i32_0 : i32, i32
  }
  func.func @transform_4(%arg0: i32) -> (i32, i32) {
    %c0_i32 = arith.constant 0 : i32
    %c0_i32_0 = arith.constant 0 : i32
    %c0_i32_1 = arith.constant 0 : i32
    return %c0_i32, %c0_i32_0 : i32, i32
  }
  func.func @transform_5(%arg0: i32) -> (i32, i32) {
    %c0_i32 = arith.constant 0 : i32
    %c0_i32_0 = arith.constant 0 : i32
    return %arg0, %c0_i32 : i32, i32
  }
}

</mosaic_0001>

<bundles_post_ra>
// kernel: tpu_custom_call.1
= control target key start
LH: loop header
LB: loop body
LE: loop exit
PB: predicated region body
PF: predicated region fallthrough
CT: control target
= control target key end

     0   :  { %10 = vsyncpa [#allocation3], 0  ;;  %s1897_s0 = inlined_call_operand.hbm [shape: bf16[128,128], index: 0, kind: input, shape index: {}]   ;;  %s1898_s1 = inlined_call_operand.hbm [shape: bf16[128,512], index: 1, kind: input, shape index: {}]   ;;  %s1899_s2 = inlined_call_operand.vmem [shape: f32[1,512], index: 2, kind: input, shape index: {}]   ;;  %s1900_s3 = inlined_call_operand.hbm [shape: bf16[512,128], index: 3, kind: input, shape index: {}]   ;;  %s1901_s4 = inlined_call_operand.vmem [shape: f32[1,128], index: 4, kind: input, shape index: {}]   ;;  %s1902_s5 = inlined_call_operand.hbm [shape: bf16[128,128], index: 5, kind: output, shape index: {}]  }
   0x1   :  { %11 = vsyncpa [#allocation6], 0 }
   0x2   :  { %12 = vsyncpa [#allocation4], 0  ;;  %s1689_s18 = smov [#allocation5]   ;;  %s1595_s22 = scalar_lea.hbm %s1898_s1, 4096 }
   0x3   :  { %s30_s19 = sshll.u32 %s1689_s18, 4  ;;  %p1596_p0 = scmp.ne.s32.totalorder %s1898_s1, %s1595_s22  ;;  %s31_s19 = int_to_ptr.vmem [resolvable:$true] %s30_s19 }
   0x4   :  { %p1599_p1 = scmp.lt.u32.totalorder %s1595_s22, %s1898_s1 }
   0x6   :  { %p1601_p2 = pnand %p1599_p1, %p1596_p0 }
   0x8   :  { %1604 = shalt.err (!%p1601_p2)
}
   0x9   :  { %s1605_s27 = scalar_lea.vmem %s31_s19, 4096  ;;  %p1610_p4 = scmp.lt.s32.totalorder %s31_s19, %s31_s19 }
   0xa   :  { %p1606_p3 = scmp.ne.s32.totalorder %s31_s19, %s1605_s27  ;;  %p1611_p5 = scmp.lt.s32.totalorder %s1605_s27, %s1605_s27 }
   0xc   :  { %p1612_p6 = por %p1611_p5, %p1610_p4 }
   0xe   :  { %p1613_p7 = pnand %p1612_p6, %p1606_p3 }
  0x10   :  { %1616 = shalt.err (!%p1613_p7)
}
  0x11   :  { %s1690_s28 = smov 256   ;;  %s1691_s29 = smov 16  }
  0x12   :  { %36 = dma.hbm_to_vmem [thread:$0]  %s1898_s1, 4096, %s31_s19, [#allocation6], %s1690_s28, %s1690_s28, %s1691_s29  }
  0x13   :  { %s1692_s7 = smov [#allocation2]   ;;  %s1617_s11 = scalar_lea.hbm %s1897_s0, 1024 }
  0x14   :  { %s18_s8 = sshll.u32 %s1692_s7, 4  ;;  %p1618_p8 = scmp.ne.s32.totalorder %s1897_s0, %s1617_s11  ;;  %s19_s8 = int_to_ptr.vmem [resolvable:$true] %s18_s8 }
  0x15   :  { %p1621_p9 = scmp.lt.u32.totalorder %s1617_s11, %s1897_s0 }
  0x17   :  { %p1623_p10 = pnand %p1621_p9, %p1618_p8 }
  0x19   :  { %1626 = shalt.err (!%p1623_p10)
}
  0x1a   :  { %s1627_s16 = scalar_lea.vmem %s19_s8, 1024  ;;  %p1632_p12 = scmp.lt.s32.totalorder %s19_s8, %s19_s8 }
  0x1b   :  { %p1628_p11 = scmp.ne.s32.totalorder %s19_s8, %s1627_s16  ;;  %p1633_p13 = scmp.lt.s32.totalorder %s1627_s16, %s1627_s16 }
  0x1d   :  { %p1634_p0 = por %p1633_p13, %p1632_p12 }
  0x1f   :  { %p1635_p1 = pnand %p1634_p0, %p1628_p11 }
  0x21   :  { %1638 = shalt.err (!%p1635_p1)
}
  0x22   :  { %s1693_s1 = smov 64   ;;  %s1694_s17 = smov 4  }
  0x23   :  { %24 = dma.hbm_to_vmem [thread:$0]  %s1897_s0, 1024, %s19_s8, [#allocation3], %s1693_s1, %s1693_s1, %s1694_s17  }
  0x24   :  { %s1695_s20 = smov [#allocation7]   ;;  %s1639_s24 = scalar_lea.hbm %s1900_s3, 4096 }
  0x25   :  { %s44_s21 = sshll.u32 %s1695_s20, 4  ;;  %p1640_p2 = scmp.ne.s32.totalorder %s1900_s3, %s1639_s24  ;;  %s45_s21 = int_to_ptr.vmem [resolvable:$true] %s44_s21 }
  0x26   :  { %p1643_p3 = scmp.lt.u32.totalorder %s1639_s24, %s1900_s3 }
  0x28   :  { %p1645_p4 = pnand %p1643_p3, %p1640_p2 }
  0x2a   :  { %1648 = shalt.err (!%p1645_p4)
}
  0x2b   :  { %s1649_s29 = scalar_lea.vmem %s45_s21, 4096  ;;  %p1654_p6 = scmp.lt.s32.totalorder %s45_s21, %s45_s21 }
  0x2c   :  { %p1650_p5 = scmp.ne.s32.totalorder %s45_s21, %s1649_s29  ;;  %p1655_p7 = scmp.lt.s32.totalorder %s1649_s29, %s1649_s29 }
  0x2e   :  { %p1656_p8 = por %p1655_p7, %p1654_p6 }
  0x30   :  { %p1657_p9 = pnand %p1656_p8, %p1650_p5 }
  0x32   :  { %1660 = shalt.err (!%p1657_p9)
}
  0x33   :  { %50 = dma.hbm_to_vmem [thread:$0]  %s1900_s3, 4096, %s45_s21, [#allocation6], %s1693_s1, %s1693_s1, %s1694_s17  }
  0x34   :  { %1683 = dma.done.wait [#allocation3], 1024  }
  0x35   :  { %1684 = vsyncadd [#allocation3], 4294966272 }
  0x36   :  { %1685 = dma.done.wait [#allocation6], 8192  }
  0x37   :  { %1686 = vsyncadd [#allocation6], 4294959104  ;;  %v1696_v0 = vmov 0   ;;  %v1507_v1 = vld [vmem:[#allocation5 + $0x4] ss:$16 sps:$4 sm:$0xff]   ;;  %v1567_v38 = vld [vmem:[#allocation7 + $0x48] sm:$0xff]  }
  0x38   :  { %373 = vmatprep.mubr.bf16.mxu0 %v1696_v0  ;;  %486 = vmatprep.mubr.bf16.mxu1 %v1696_v0  ;;  %v1509_v2 = vld [vmem:[#allocation5 + $0xc] ss:$16 sps:$4 sm:$0xff]   ;;  %v1511_v3 = vld [vmem:[#allocation5] ss:$16 sps:$4 sm:$0xff]   ;;  %v1512_v4 = vld [vmem:[#allocation5 + $0x8] ss:$16 sps:$4 sm:$0xff]  }
  0x39   :  { %341 = vmatprep.subr.bf16.mxu0 %v1507_v1  ;;  %454 = vmatprep.subr.bf16.mxu1 %v1509_v2  ;;  %v1513_v5 = vld [vmem:[#allocation5 + $0x24] ss:$16 sps:$4 sm:$0xff]   ;;  %v1515_v6 = vld [vmem:[#allocation5 + $0x2c] ss:$16 sps:$4 sm:$0xff]   ;;  %v1517_v7 = vld [vmem:[#allocation5 + $0x20] ss:$16 sps:$4 sm:$0xff]  }
  0x3a   :  { %342 = vmatpush1.bf16.msra.mxu0 %v1511_v3  ;;  %455 = vmatpush1.bf16.msra.mxu1 %v1512_v4  ;;  %v1518_v8 = vld [vmem:[#allocation5 + $0x28] ss:$16 sps:$4 sm:$0xff]   ;;  %v1519_v9 = vld [vmem:[#allocation5 + $0x44] ss:$16 sps:$4 sm:$0xff]   ;;  %v1521_v10 = vld [vmem:[#allocation5 + $0x4c] ss:$16 sps:$4 sm:$0xff]  }
  0x3b   :  { %343 = vmatprep.subr.bf16.mxu0 %v1513_v5  ;;  %456 = vmatprep.subr.bf16.mxu1 %v1515_v6  ;;  %v1523_v11 = vld [vmem:[#allocation5 + $0x40] ss:$16 sps:$4 sm:$0xff]   ;;  %v1524_v12 = vld [vmem:[#allocation5 + $0x48] ss:$16 sps:$4 sm:$0xff]   ;;  %v1525_v13 = vld [vmem:[#allocation5 + $0x64] ss:$16 sps:$4 sm:$0xff]  }
  0x3c   :  { %v1527_v14 = vld [vmem:[#allocation5 + $0x6c] ss:$16 sps:$4 sm:$0xff]   ;;  %v1529_v15 = vld [vmem:[#allocation5 + $0x60] ss:$16 sps:$4 sm:$0xff]   ;;  %v1530_v16 = vld [vmem:[#allocation5 + $0x68] ss:$16 sps:$4 sm:$0xff]  }
  0x3d   :  { %v1531_v17 = vld [vmem:[#allocation5 + $0x84] ss:$16 sps:$4 sm:$0xff]   ;;  %v1533_v18 = vld [vmem:[#allocation5 + $0x8c] ss:$16 sps:$4 sm:$0xff]   ;;  %v1535_v19 = vld [vmem:[#allocation5 + $0x80] ss:$16 sps:$4 sm:$0xff]  }
  0x3e   :  { %344 = vmatpush1.bf16.msra.mxu0 %v1517_v7  ;;  %457 = vmatpush1.bf16.msra.mxu1 %v1518_v8  ;;  %v1536_v20 = vld [vmem:[#allocation5 + $0x88] ss:$16 sps:$4 sm:$0xff]   ;;  %v1537_v21 = vld [vmem:[#allocation5 + $0xa4] ss:$16 sps:$4 sm:$0xff]   ;;  %v1539_v22 = vld [vmem:[#allocation5 + $0xac] ss:$16 sps:$4 sm:$0xff]  }
  0x3f   :  { %345 = vmatprep.subr.bf16.mxu0 %v1519_v9  ;;  %458 = vmatprep.subr.bf16.mxu1 %v1521_v10  ;;  %v1541_v23 = vld [vmem:[#allocation5 + $0xa0] ss:$16 sps:$4 sm:$0xff]   ;;  %v1542_v24 = vld [vmem:[#allocation5 + $0xa8] ss:$16 sps:$4 sm:$0xff]   ;;  %v1543_v25 = vld [vmem:[#allocation5 + $0xc4] ss:$16 sps:$4 sm:$0xff]   ;;  %v113_v10 = vlaneseq }
  0x40   :  { %v1545_v26 = vld [vmem:[#allocation5 + $0xcc] ss:$16 sps:$4 sm:$0xff]   ;;  %v1547_v27 = vld [vmem:[#allocation5 + $0xc0] ss:$16 sps:$4 sm:$0xff]   ;;  %v1548_v28 = vld [vmem:[#allocation5 + $0xc8] ss:$16 sps:$4 sm:$0xff]  }
  0x41   :  { %v1549_v29 = vld [vmem:[#allocation5 + $0xe4] ss:$16 sps:$4 sm:$0xff]   ;;  %v1551_v30 = vld [vmem:[#allocation5 + $0xec] ss:$16 sps:$4 sm:$0xff]   ;;  %v1553_v31 = vld [vmem:[#allocation5 + $0xe0] ss:$16 sps:$4 sm:$0xff]  }
  0x42   :  { %346 = vmatpush1.bf16.msra.mxu0 %v1523_v11  ;;  %459 = vmatpush1.bf16.msra.mxu1 %v1524_v12  ;;  %v1554_v32 = vld [vmem:[#allocation5 + $0xe8] ss:$16 sps:$4 sm:$0xff]   ;;  %v1555_v33 = vld [vmem:[#allocation2] sm:$0xff]   ;;  %v1571_v43 = vld [vmem:[#allocation7 + $0x50] sm:$0xff]   ;;  %v114_v11 = vshrl.u32 %v113_v10, 7 }
  0x43   :  { %347 = vmatprep.subr.bf16.mxu0 %v1525_v13  ;;  %460 = vmatprep.subr.bf16.mxu1 %v1527_v14  ;;  %v1563_v34 = vld [vmem:[#allocation7 + $0x40] sm:$0xff]   ;;  %v1568_v39 = vld [vmem:[#allocation7 + $0x8] sm:$0xff]   ;;  %v1572_v44 = vld [vmem:[#allocation7 + $0x10] sm:$0xff]  }
  0x44   :  { %v1564_v35 = vld [vmem:[#allocation7] sm:$0xff]   ;;  %v1569_v40 = vld [vmem:[#allocation7 + $0xc8] sm:$0xff]   ;;  %v1573_v45 = vld [vmem:[#allocation7 + $0xd0] sm:$0xff]   ;;  %v115_v12 = vsub.s32 0, %v114_v11  ;;  %v123_v13 = vsub.s32 2, %v114_v11 }
  0x45   :  { %v1565_v36 = vld [vmem:[#allocation7 + $0xc0] sm:$0xff]   ;;  %v1556_v41 = vld [vmem:[#allocation2 + $0x8] sm:$0xff]   ;;  %v1574_v46 = vld [vmem:[#allocation7 + $0x90] sm:$0xff]  }
  0x46   :  { %348 = vmatpush1.bf16.msra.mxu0 %v1529_v15  ;;  %461 = vmatpush1.bf16.msra.mxu1 %v1530_v16  ;;  %v1566_v37 = vld [vmem:[#allocation7 + $0x80] sm:$0xff]   ;;  %v1570_v42 = vld [vmem:[#allocation7 + $0x88] sm:$0xff]   ;;  %v1575_v47 = vld [vmem:[#allocation7 + $0x58] sm:$0xff]   ;;  %v127_v15 = vsub.s32 3, %v114_v11 }
  0x47   :  { %349 = vmatprep.subr.bf16.mxu0 %v1531_v17  ;;  %462 = vmatprep.subr.bf16.mxu1 %v1533_v18  ;;  %v1576_v48 = vld [vmem:[#allocation7 + $0x18] sm:$0xff]   ;;  %v1557_v50 = vld [vmem:[#allocation2 + $0x10] sm:$0xff]   ;;  %v1579_v52 = vld [vmem:[#allocation7 + $0x60] sm:$0xff]  }
  0x48   :  { %v1577_v49 = vld [vmem:[#allocation7 + $0xd8] sm:$0xff]   ;;  %v1580_v53 = vld [vmem:[#allocation7 + $0x20] sm:$0xff]   ;;  %v1583_v56 = vld [vmem:[#allocation7 + $0x68] sm:$0xff]  }
  0x49   :  { %v1578_v51 = vld [vmem:[#allocation7 + $0x98] sm:$0xff]   ;;  %v1581_v54 = vld [vmem:[#allocation7 + $0xe0] sm:$0xff]   ;;  %v1584_v57 = vld [vmem:[#allocation7 + $0x28] sm:$0xff]  }
  0x4a   :  { %350 = vmatpush1.bf16.msra.mxu0 %v1535_v19  ;;  %463 = vmatpush1.bf16.msra.mxu1 %v1536_v20  ;;  %v1582_v55 = vld [vmem:[#allocation7 + $0xa0] sm:$0xff]   ;;  %v1585_v58 = vld [vmem:[#allocation7 + $0xe8] sm:$0xff]   ;;  %v1587_v60 = vld [vmem:[#allocation7 + $0x70] sm:$0xff]  }
  0x4b   :  { %351 = vmatprep.subr.bf16.mxu0 %v1537_v21  ;;  %464 = vmatprep.subr.bf16.mxu1 %v1539_v22  ;;  %v1586_v59 = vld [vmem:[#allocation7 + $0xa8] sm:$0xff]   ;;  %v1558_v61 = vld [vmem:[#allocation2 + $0x18] sm:$0xff]   ;;  %v1589_v62 = vld [vmem:[#allocation7 + $0xf0] sm:$0xff]  }
  0x4c   :  { %v1588_v63 = vld [vmem:[#allocation7 + $0x30] sm:$0xff]   ;;  %v1559_v2 = vld [vmem:[#allocation2 + $0x20] sm:$0xff]   ;;  %v1560_v3 = vld [vmem:[#allocation2 + $0x28] sm:$0xff]  }
  0x4d   :  { %v1590_v1 = vld [vmem:[#allocation7 + $0xb0] sm:$0xff]   ;;  %v1562_v5 = vld [vmem:[#allocation2 + $0x38] sm:$0xff]   ;;  %v111_v14 = vld [vmem:[%s1899_s2] sm:$0xf] }
  0x4e   :  { %352 = vmatpush1.bf16.msra.mxu0 %v1541_v23  ;;  %465 = vmatpush1.bf16.msra.mxu1 %v1542_v24  ;;  %v1561_v4 = vld [vmem:[#allocation2 + $0x30] sm:$0xff]   ;;  %v1591_v6 = vld [vmem:[#allocation7 + $0x78] sm:$0xff]   ;;  %v1789_v16 = vrot.slane %v111_v14, %v115_v12  ;;  %v1791_v17 = vrot.slane %v111_v14, %v123_v13  ;;  %v1795_v19 = vrot.slane %v111_v14, %v127_v15 }
  0x4f   :  { %353 = vmatprep.subr.bf16.mxu0 %v1543_v25  ;;  %466 = vmatprep.subr.bf16.mxu1 %v1545_v26  ;;  %v1593_v7 = vld [vmem:[#allocation7 + $0xf8] sm:$0xff]  }
  0x50   :  { %v1592_v8 = vld [vmem:[#allocation7 + $0x38] sm:$0xff]  }
  0x51   :  { %v1594_v9 = vld [vmem:[#allocation7 + $0xb8] sm:$0xff]  }
  0x52   :  { %354 = vmatpush1.bf16.msra.mxu0 %v1547_v27  ;;  %467 = vmatpush1.bf16.msra.mxu1 %v1548_v28 }
  0x53   :  { %355 = vmatprep.subr.bf16.mxu0 %v1549_v29  ;;  %468 = vmatprep.subr.bf16.mxu1 %v1551_v30 }
  0x56   :  { %356 = vmatpush1.bf16.msra.mxu0 %v1553_v31  ;;  %469 = vmatpush1.bf16.msra.mxu1 %v1554_v32 }
  0x57   :  { %1370 = vmatprep.subr.bf16.mxu0 %v1563_v34  ;;  %1434 = vmatprep.subr.bf16.mxu1 %v1565_v36 }
  0x59   :  { %374 = vmatmul.mubr.bf16.vlgmr.msra.gmra.mrb[0].mxu0 %v1555_v33  ;;  %487 = vmatmul.mubr.bf16.vlgmr.msra.gmra.mrb[0].mxu1 %v1555_v33 }
  0x5a   :  { %383 = vmatprep.mubr.bf16.mxu0 %v1696_v0  ;;  %496 = vmatprep.mubr.bf16.mxu1 %v1696_v0 }
  0x5b   :  { %1371 = vmatpush3.bf16.msra.mxu0 %v1564_v35  ;;  %1435 = vmatpush3.bf16.msra.mxu1 %v1566_v37 }
  0x5c   :  { %1372 = vmatprep.subr.bf16.mxu0 %v1567_v38  ;;  %1436 = vmatprep.subr.bf16.mxu1 %v1569_v40 }
  0x5f   :  { %1373 = vmatpush3.bf16.msra.mxu0 %v1568_v39  ;;  %1437 = vmatpush3.bf16.msra.mxu1 %v1570_v42 }
  0x60   :  { %1374 = vmatprep.subr.bf16.mxu0 %v1571_v43  ;;  %1438 = vmatprep.subr.bf16.mxu1 %v1573_v45 }
  0x61   :  { %384 = vmatmul.mubr.bf16.gmra.mrb[4].mxu0 %v1556_v41  ;;  %497 = vmatmul.mubr.bf16.gmra.mrb[4].mxu1 %v1556_v41 }
  0x62   :  { %393 = vmatprep.mubr.bf16.mxu0 %v1696_v0  ;;  %506 = vmatprep.mubr.bf16.mxu1 %v1696_v0 }
  0x63   :  { %1375 = vmatpush3.bf16.msra.mxu0 %v1572_v44  ;;  %1439 = vmatpush3.bf16.msra.mxu1 %v1574_v46 }
  0x64   :  { %1376 = vmatprep.subr.bf16.mxu0 %v1575_v47  ;;  %1440 = vmatprep.subr.bf16.mxu1 %v1577_v49 }
  0x67   :  { %1377 = vmatpush3.bf16.msra.mxu0 %v1576_v48  ;;  %1441 = vmatpush3.bf16.msra.mxu1 %v1578_v51 }
  0x68   :  { %1378 = vmatprep.subr.bf16.mxu0 %v1579_v52  ;;  %1442 = vmatprep.subr.bf16.mxu1 %v1581_v54 }
  0x69   :  { %394 = vmatmul.mubr.bf16.gmra.mrb[8].mxu0 %v1557_v50  ;;  %507 = vmatmul.mubr.bf16.gmra.mrb[8].mxu1 %v1557_v50 }
  0x6a   :  { %403 = vmatprep.mubr.bf16.mxu0 %v1696_v0  ;;  %516 = vmatprep.mubr.bf16.mxu1 %v1696_v0 }
  0x6b   :  { %1379 = vmatpush3.bf16.msra.mxu0 %v1580_v53  ;;  %1443 = vmatpush3.bf16.msra.mxu1 %v1582_v55 }
  0x6c   :  { %1380 = vmatprep.subr.bf16.mxu0 %v1583_v56  ;;  %1444 = vmatprep.subr.bf16.mxu1 %v1585_v58 }
  0x6f   :  { %1381 = vmatpush3.bf16.msra.mxu0 %v1584_v57  ;;  %1445 = vmatpush3.bf16.msra.mxu1 %v1586_v59 }
  0x70   :  { %1382 = vmatprep.subr.bf16.mxu0 %v1587_v60  ;;  %1446 = vmatprep.subr.bf16.mxu1 %v1589_v62 }
  0x71   :  { %404 = vmatmul.mubr.bf16.gmra.mrb[12].mxu0 %v1558_v61  ;;  %517 = vmatmul.mubr.bf16.gmra.mrb[12].mxu1 %v1558_v61 }
  0x72   :  { %413 = vmatprep.mubr.bf16.mxu0 %v1696_v0  ;;  %526 = vmatprep.mubr.bf16.mxu1 %v1696_v0 }
  0x73   :  { %1383 = vmatpush3.bf16.msra.mxu0 %v1588_v63  ;;  %1447 = vmatpush3.bf16.msra.mxu1 %v1590_v1 }
  0x74   :  { %1384 = vmatprep.subr.bf16.mxu0 %v1591_v6  ;;  %1448 = vmatprep.subr.bf16.mxu1 %v1593_v7 }
  0x77   :  { %1385 = vmatpush3.bf16.msra.mxu0 %v1592_v8  ;;  %1449 = vmatpush3.bf16.msra.mxu1 %v1594_v9 }
  0x79   :  { %414 = vmatmul.mubr.bf16.gmra.mrb[16].mxu0 %v1559_v2  ;;  %527 = vmatmul.mubr.bf16.gmra.mrb[16].mxu1 %v1559_v2 }
  0x7a   :  { %423 = vmatprep.mubr.bf16.mxu0 %v1696_v0  ;;  %536 = vmatprep.mubr.bf16.mxu1 %v1696_v0 }
  0x81   :  { %424 = vmatmul.mubr.bf16.gmra.mrb[20].mxu0 %v1560_v3  ;;  %537 = vmatmul.mubr.bf16.gmra.mrb[20].mxu1 %v1560_v3 }
  0x82   :  { %433 = vmatprep.mubr.bf16.mxu0 %v1696_v0  ;;  %546 = vmatprep.mubr.bf16.mxu1 %v1696_v0 }
  0x89   :  { %434 = vmatmul.mubr.bf16.gmra.mrb[24].mxu0 %v1561_v4  ;;  %547 = vmatmul.mubr.bf16.gmra.mrb[24].mxu1 %v1561_v4 }
  0x8a   :  { %443 = vmatprep.mubr.bf16.mxu0 %v1696_v0  ;;  %556 = vmatprep.mubr.bf16.mxu1 %v1696_v0  ;;  %v119_v0 = vsub.s32 1, %v114_v11 }
  0x8c   :  { %v1793_v18 = vrot.slane %v111_v14, %v119_v0 }
  0x91   :  { %444 = vmatmul.mubr.bf16.gmra.mrb[28].mxu0 %v1562_v5  ;;  %557 = vmatmul.mubr.bf16.gmra.mrb[28].mxu1 %v1562_v5 }
 0x12c   :  { %v375_v20 = vpop.f32.mrb[0].mxu0  ;;  %v488_v21 = vpop.f32.mrb[0].mxu1 }
 0x12d   :  { %v376_v22 = vadd.f32 %v375_v20, %v1789_v16  ;;  %v489_v23 = vadd.f32 %v488_v21, %v1791_v17  ;;  %v377_v24 = vpop.f32.mrb[1].mxu0  ;;  %v490_v25 = vpop.f32.mrb[1].mxu1 }
 0x12e   :  { %v378_v26 = vadd.f32 %v377_v24, %v1793_v18  ;;  %v491_v27 = vadd.f32 %v490_v25, %v1795_v19  ;;  %v379_v28 = vpop.f32.mrb[2].mxu0  ;;  %v492_v29 = vpop.f32.mrb[2].mxu1 }
 0x12f   :  { %v569_v30 = vmax.f32 %v489_v23, 0.0  ;;  %v380_v31 = vadd.f32 %v379_v28, %v1789_v16  ;;  %v493_v32 = vadd.f32 %v492_v29, %v1791_v17  ;;  %v381_v33 = vpop.f32.mrb[3].mxu0  ;;  %v494_v34 = vpop.f32.mrb[3].mxu1  ;;  %v567_v38 = vmax.f32 %v376_v22, 0.0 }
 0x130   :  { %v570_v35 = vmax.f32 %v491_v27, 0.0  ;;  %v382_v36 = vadd.f32 %v381_v33, %v1793_v18  ;;  %v495_v37 = vadd.f32 %v494_v34, %v1795_v19  ;;  %v568_v41 = vmax.f32 %v378_v26, 0.0 }
 0x131   :  { %v571_v39 = vmax.f32 %v380_v31, 0.0  ;;  %v573_v40 = vmax.f32 %v493_v32, 0.0 }
 0x132   :  { %v572_v42 = vmax.f32 %v382_v36, 0.0  ;;  %v574_v43 = vmax.f32 %v495_v37, 0.0 }
 0x133   :  { %v631_v44 = vpack.c.bf16 %v571_v39, %v567_v38  ;;  %v633_v45 = vpack.c.bf16 %v573_v40, %v569_v30 }
 0x134   :  { %v632_v46 = vpack.c.bf16 %v572_v42, %v568_v41  ;;  %v634_v47 = vpack.c.bf16 %v574_v43, %v570_v35  ;;  %v385_v48 = vpop.f32.mrb[4].mxu0  ;;  %v498_v49 = vpop.f32.mrb[4].mxu1 }
 0x135   :  { %v386_v50 = vadd.f32 %v385_v48, %v1789_v16  ;;  %v499_v51 = vadd.f32 %v498_v49, %v1791_v17  ;;  %v387_v52 = vpop.f32.mrb[5].mxu0  ;;  %v500_v53 = vpop.f32.mrb[5].mxu1 }
 0x136   :  { %v388_v54 = vadd.f32 %v387_v52, %v1793_v18  ;;  %v501_v55 = vadd.f32 %v500_v53, %v1795_v19  ;;  %v389_v56 = vpop.f32.mrb[6].mxu0  ;;  %v502_v57 = vpop.f32.mrb[6].mxu1  ;;  %958 = vmatprep.mubr.bf16.mxu0 %v632_v46  ;;  %1055 = vmatprep.mubr.bf16.mxu1 %v634_v47 }
 0x137   :  { %v577_v58 = vmax.f32 %v499_v51, 0.0  ;;  %v390_v59 = vadd.f32 %v389_v56, %v1789_v16  ;;  %v503_v60 = vadd.f32 %v502_v57, %v1791_v17  ;;  %v391_v61 = vpop.f32.mrb[7].mxu0  ;;  %v504_v62 = vpop.f32.mrb[7].mxu1  ;;  %959 = vmatmul.mubr.bf16.vlgmr.msra.gmra.mrb[32].mxu0 %v631_v44  ;;  %1056 = vmatmul.mubr.bf16.vlgmr.msra.gmra.mrb[32].mxu1 %v633_v45  ;;  %v575_v3 = vmax.f32 %v386_v50, 0.0 }
 0x138   :  { %v578_v63 = vmax.f32 %v501_v55, 0.0  ;;  %v392_v1 = vadd.f32 %v391_v61, %v1793_v18  ;;  %v505_v2 = vadd.f32 %v504_v62, %v1795_v19  ;;  %v576_v6 = vmax.f32 %v388_v54, 0.0 }
 0x139   :  { %v579_v4 = vmax.f32 %v390_v59, 0.0  ;;  %v581_v5 = vmax.f32 %v503_v60, 0.0 }
 0x13a   :  { %v580_v7 = vmax.f32 %v392_v1, 0.0  ;;  %v582_v8 = vmax.f32 %v505_v2, 0.0 }
 0x13b   :  { %v635_v9 = vpack.c.bf16 %v579_v4, %v575_v3  ;;  %v637_v10 = vpack.c.bf16 %v581_v5, %v577_v58 }
 0x13c   :  { %v636_v11 = vpack.c.bf16 %v580_v7, %v576_v6  ;;  %v638_v12 = vpack.c.bf16 %v582_v8, %v578_v63  ;;  %v395_v13 = vpop.f32.mrb[8].mxu0  ;;  %v508_v14 = vpop.f32.mrb[8].mxu1 }
 0x13d   :  { %v396_v0 = vadd.f32 %v395_v13, %v1789_v16  ;;  %v509_v15 = vadd.f32 %v508_v14, %v1791_v17  ;;  %v397_v20 = vpop.f32.mrb[9].mxu0  ;;  %v510_v21 = vpop.f32.mrb[9].mxu1 }
 0x13e   :  { %v398_v22 = vadd.f32 %v397_v20, %v1793_v18  ;;  %v511_v23 = vadd.f32 %v510_v21, %v1795_v19  ;;  %v399_v24 = vpop.f32.mrb[10].mxu0  ;;  %v512_v25 = vpop.f32.mrb[10].mxu1  ;;  %966 = vmatprep.mubr.bf16.mxu0 %v636_v11  ;;  %1063 = vmatprep.mubr.bf16.mxu1 %v638_v12 }
 0x13f   :  { %v585_v26 = vmax.f32 %v509_v15, 0.0  ;;  %v400_v27 = vadd.f32 %v399_v24, %v1789_v16  ;;  %v513_v28 = vadd.f32 %v512_v25, %v1791_v17  ;;  %v401_v29 = vpop.f32.mrb[11].mxu0  ;;  %v514_v30 = vpop.f32.mrb[11].mxu1  ;;  %967 = vmatmul.mubr.bf16.gmra.mrb[36].mxu0 %v635_v9  ;;  %1064 = vmatmul.mubr.bf16.gmra.mrb[36].mxu1 %v637_v10  ;;  %v583_v34 = vmax.f32 %v396_v0, 0.0 }
 0x140   :  { %v586_v31 = vmax.f32 %v511_v23, 0.0  ;;  %v402_v32 = vadd.f32 %v401_v29, %v1793_v18  ;;  %v515_v33 = vadd.f32 %v514_v30, %v1795_v19  ;;  %v584_v37 = vmax.f32 %v398_v22, 0.0 }
 0x141   :  { %v587_v35 = vmax.f32 %v400_v27, 0.0  ;;  %v589_v36 = vmax.f32 %v513_v28, 0.0 }
 0x142   :  { %v588_v38 = vmax.f32 %v402_v32, 0.0  ;;  %v590_v39 = vmax.f32 %v515_v33, 0.0 }
 0x143   :  { %v639_v40 = vpack.c.bf16 %v587_v35, %v583_v34  ;;  %v641_v41 = vpack.c.bf16 %v589_v36, %v585_v26 }
 0x144   :  { %v640_v42 = vpack.c.bf16 %v588_v38, %v584_v37  ;;  %v642_v43 = vpack.c.bf16 %v590_v39, %v586_v31  ;;  %v405_v44 = vpop.f32.mrb[12].mxu0  ;;  %v518_v45 = vpop.f32.mrb[12].mxu1 }
 0x145   :  { %v406_v46 = vadd.f32 %v405_v44, %v1789_v16  ;;  %v519_v47 = vadd.f32 %v518_v45, %v1791_v17  ;;  %v407_v48 = vpop.f32.mrb[13].mxu0  ;;  %v520_v49 = vpop.f32.mrb[13].mxu1 }
 0x146   :  { %v408_v50 = vadd.f32 %v407_v48, %v1793_v18  ;;  %v521_v51 = vadd.f32 %v520_v49, %v1795_v19  ;;  %v409_v52 = vpop.f32.mrb[14].mxu0  ;;  %v522_v53 = vpop.f32.mrb[14].mxu1  ;;  %974 = vmatprep.mubr.bf16.mxu0 %v640_v42  ;;  %1071 = vmatprep.mubr.bf16.mxu1 %v642_v43 }
 0x147   :  { %v593_v54 = vmax.f32 %v519_v47, 0.0  ;;  %v410_v55 = vadd.f32 %v409_v52, %v1789_v16  ;;  %v523_v56 = vadd.f32 %v522_v53, %v1791_v17  ;;  %v411_v57 = vpop.f32.mrb[15].mxu0  ;;  %v524_v58 = vpop.f32.mrb[15].mxu1  ;;  %975 = vmatmul.mubr.bf16.gmra.mrb[40].mxu0 %v639_v40  ;;  %1072 = vmatmul.mubr.bf16.gmra.mrb[40].mxu1 %v641_v41  ;;  %v591_v62 = vmax.f32 %v406_v46, 0.0 }
 0x148   :  { %v594_v59 = vmax.f32 %v521_v51, 0.0  ;;  %v412_v60 = vadd.f32 %v411_v57, %v1793_v18  ;;  %v525_v61 = vadd.f32 %v524_v58, %v1795_v19  ;;  %v592_v2 = vmax.f32 %v408_v50, 0.0 }
 0x149   :  { %v595_v63 = vmax.f32 %v410_v55, 0.0  ;;  %v597_v1 = vmax.f32 %v523_v56, 0.0 }
 0x14a   :  { %v596_v3 = vmax.f32 %v412_v60, 0.0  ;;  %v598_v4 = vmax.f32 %v525_v61, 0.0 }
 0x14b   :  { %v643_v5 = vpack.c.bf16 %v595_v63, %v591_v62  ;;  %v645_v6 = vpack.c.bf16 %v597_v1, %v593_v54 }
 0x14c   :  { %v644_v7 = vpack.c.bf16 %v596_v3, %v592_v2  ;;  %v646_v8 = vpack.c.bf16 %v598_v4, %v594_v59  ;;  %v415_v9 = vpop.f32.mrb[16].mxu0  ;;  %v528_v10 = vpop.f32.mrb[16].mxu1 }
 0x14d   :  { %v416_v11 = vadd.f32 %v415_v9, %v1789_v16  ;;  %v529_v12 = vadd.f32 %v528_v10, %v1791_v17  ;;  %v417_v13 = vpop.f32.mrb[17].mxu0  ;;  %v530_v14 = vpop.f32.mrb[17].mxu1 }
 0x14e   :  { %v418_v0 = vadd.f32 %v417_v13, %v1793_v18  ;;  %v531_v15 = vadd.f32 %v530_v14, %v1795_v19  ;;  %v419_v20 = vpop.f32.mrb[18].mxu0  ;;  %v532_v21 = vpop.f32.mrb[18].mxu1  ;;  %982 = vmatprep.mubr.bf16.mxu0 %v644_v7  ;;  %1079 = vmatprep.mubr.bf16.mxu1 %v646_v8 }
 0x14f   :  { %v601_v22 = vmax.f32 %v529_v12, 0.0  ;;  %v420_v23 = vadd.f32 %v419_v20, %v1789_v16  ;;  %v533_v24 = vadd.f32 %v532_v21, %v1791_v17  ;;  %v421_v25 = vpop.f32.mrb[19].mxu0  ;;  %v534_v26 = vpop.f32.mrb[19].mxu1  ;;  %983 = vmatmul.mubr.bf16.gmra.mrb[44].mxu0 %v643_v5  ;;  %1080 = vmatmul.mubr.bf16.gmra.mrb[44].mxu1 %v645_v6  ;;  %v599_v30 = vmax.f32 %v416_v11, 0.0 }
 0x150   :  { %v602_v27 = vmax.f32 %v531_v15, 0.0  ;;  %v422_v28 = vadd.f32 %v421_v25, %v1793_v18  ;;  %v535_v29 = vadd.f32 %v534_v26, %v1795_v19  ;;  %v600_v33 = vmax.f32 %v418_v0, 0.0 }
 0x151   :  { %v603_v31 = vmax.f32 %v420_v23, 0.0  ;;  %v605_v32 = vmax.f32 %v533_v24, 0.0 }
 0x152   :  { %v604_v34 = vmax.f32 %v422_v28, 0.0  ;;  %v606_v35 = vmax.f32 %v535_v29, 0.0 }
 0x153   :  { %v647_v36 = vpack.c.bf16 %v603_v31, %v599_v30  ;;  %v649_v37 = vpack.c.bf16 %v605_v32, %v601_v22 }
 0x154   :  { %v648_v38 = vpack.c.bf16 %v604_v34, %v600_v33  ;;  %v650_v39 = vpack.c.bf16 %v606_v35, %v602_v27  ;;  %v425_v40 = vpop.f32.mrb[20].mxu0  ;;  %v538_v41 = vpop.f32.mrb[20].mxu1 }
 0x155   :  { %v426_v42 = vadd.f32 %v425_v40, %v1789_v16  ;;  %v539_v43 = vadd.f32 %v538_v41, %v1791_v17  ;;  %v427_v44 = vpop.f32.mrb[21].mxu0  ;;  %v540_v45 = vpop.f32.mrb[21].mxu1 }
 0x156   :  { %v428_v46 = vadd.f32 %v427_v44, %v1793_v18  ;;  %v541_v47 = vadd.f32 %v540_v45, %v1795_v19  ;;  %v429_v48 = vpop.f32.mrb[22].mxu0  ;;  %v542_v49 = vpop.f32.mrb[22].mxu1  ;;  %990 = vmatprep.mubr.bf16.mxu0 %v648_v38  ;;  %1087 = vmatprep.mubr.bf16.mxu1 %v650_v39 }
 0x157   :  { %v609_v50 = vmax.f32 %v539_v43, 0.0  ;;  %v430_v51 = vadd.f32 %v429_v48, %v1789_v16  ;;  %v543_v52 = vadd.f32 %v542_v49, %v1791_v17  ;;  %v431_v53 = vpop.f32.mrb[23].mxu0  ;;  %v544_v54 = vpop.f32.mrb[23].mxu1  ;;  %991 = vmatmul.mubr.bf16.gmra.mrb[48].mxu0 %v647_v36  ;;  %1088 = vmatmul.mubr.bf16.gmra.mrb[48].mxu1 %v649_v37  ;;  %v607_v58 = vmax.f32 %v426_v42, 0.0 }
 0x158   :  { %v610_v55 = vmax.f32 %v541_v47, 0.0  ;;  %v432_v56 = vadd.f32 %v431_v53, %v1793_v18  ;;  %v545_v57 = vadd.f32 %v544_v54, %v1795_v19  ;;  %v608_v61 = vmax.f32 %v428_v46, 0.0 }
 0x159   :  { %v611_v59 = vmax.f32 %v430_v51, 0.0  ;;  %v613_v60 = vmax.f32 %v543_v52, 0.0 }
 0x15a   :  { %v612_v62 = vmax.f32 %v432_v56, 0.0  ;;  %v614_v63 = vmax.f32 %v545_v57, 0.0 }
 0x15b   :  { %v651_v1 = vpack.c.bf16 %v611_v59, %v607_v58  ;;  %v653_v2 = vpack.c.bf16 %v613_v60, %v609_v50 }
 0x15c   :  { %v652_v3 = vpack.c.bf16 %v612_v62, %v608_v61  ;;  %v654_v4 = vpack.c.bf16 %v614_v63, %v610_v55  ;;  %v435_v5 = vpop.f32.mrb[24].mxu0  ;;  %v548_v6 = vpop.f32.mrb[24].mxu1 }
 0x15d   :  { %v436_v7 = vadd.f32 %v435_v5, %v1789_v16  ;;  %v549_v8 = vadd.f32 %v548_v6, %v1791_v17  ;;  %v437_v9 = vpop.f32.mrb[25].mxu0  ;;  %v550_v10 = vpop.f32.mrb[25].mxu1 }
 0x15e   :  { %v438_v11 = vadd.f32 %v437_v9, %v1793_v18  ;;  %v551_v12 = vadd.f32 %v550_v10, %v1795_v19  ;;  %v439_v13 = vpop.f32.mrb[26].mxu0  ;;  %v552_v14 = vpop.f32.mrb[26].mxu1  ;;  %998 = vmatprep.mubr.bf16.mxu0 %v652_v3  ;;  %1095 = vmatprep.mubr.bf16.mxu1 %v654_v4 }
 0x15f   :  { %v617_v0 = vmax.f32 %v549_v8, 0.0  ;;  %v440_v15 = vadd.f32 %v439_v13, %v1789_v16  ;;  %v553_v20 = vadd.f32 %v552_v14, %v1791_v17  ;;  %v441_v21 = vpop.f32.mrb[27].mxu0  ;;  %v554_v22 = vpop.f32.mrb[27].mxu1  ;;  %999 = vmatmul.mubr.bf16.gmra.mrb[52].mxu0 %v651_v1  ;;  %1096 = vmatmul.mubr.bf16.gmra.mrb[52].mxu1 %v653_v2  ;;  %v615_v26 = vmax.f32 %v436_v7, 0.0 }
 0x160   :  { %v618_v23 = vmax.f32 %v551_v12, 0.0  ;;  %v442_v24 = vadd.f32 %v441_v21, %v1793_v18  ;;  %v555_v25 = vadd.f32 %v554_v22, %v1795_v19  ;;  %v616_v29 = vmax.f32 %v438_v11, 0.0 }
 0x161   :  { %v619_v27 = vmax.f32 %v440_v15, 0.0  ;;  %v621_v28 = vmax.f32 %v553_v20, 0.0 }
 0x162   :  { %v620_v30 = vmax.f32 %v442_v24, 0.0  ;;  %v622_v31 = vmax.f32 %v555_v25, 0.0 }
 0x163   :  { %v655_v32 = vpack.c.bf16 %v619_v27, %v615_v26  ;;  %v657_v33 = vpack.c.bf16 %v621_v28, %v617_v0 }
 0x164   :  { %v656_v34 = vpack.c.bf16 %v620_v30, %v616_v29  ;;  %v658_v35 = vpack.c.bf16 %v622_v31, %v618_v23  ;;  %v445_v36 = vpop.f32.mrb[28].mxu0  ;;  %v558_v37 = vpop.f32.mrb[28].mxu1 }
 0x165   :  { %v446_v38 = vadd.f32 %v445_v36, %v1789_v16  ;;  %v559_v39 = vadd.f32 %v558_v37, %v1791_v17  ;;  %v447_v40 = vpop.f32.mrb[29].mxu0  ;;  %v560_v41 = vpop.f32.mrb[29].mxu1 }
 0x166   :  { %v448_v42 = vadd.f32 %v447_v40, %v1793_v18  ;;  %v561_v43 = vadd.f32 %v560_v41, %v1795_v19  ;;  %v449_v44 = vpop.f32.mrb[30].mxu0  ;;  %v562_v45 = vpop.f32.mrb[30].mxu1  ;;  %1006 = vmatprep.mubr.bf16.mxu0 %v656_v34  ;;  %1103 = vmatprep.mubr.bf16.mxu1 %v658_v35 }
 0x167   :  { %v625_v46 = vmax.f32 %v559_v39, 0.0  ;;  %v450_v47 = vadd.f32 %v449_v44, %v1789_v16  ;;  %v563_v48 = vadd.f32 %v562_v45, %v1791_v17  ;;  %v451_v49 = vpop.f32.mrb[31].mxu0  ;;  %v564_v50 = vpop.f32.mrb[31].mxu1  ;;  %1007 = vmatmul.mubr.bf16.gmra.mrb[56].mxu0 %v655_v32  ;;  %1104 = vmatmul.mubr.bf16.gmra.mrb[56].mxu1 %v657_v33  ;;  %v623_v54 = vmax.f32 %v446_v38, 0.0 }
 0x168   :  { %v626_v51 = vmax.f32 %v561_v43, 0.0  ;;  %v452_v52 = vadd.f32 %v451_v49, %v1793_v18  ;;  %v565_v53 = vadd.f32 %v564_v50, %v1795_v19  ;;  %v624_v57 = vmax.f32 %v448_v42, 0.0  ;;  %v1864_v18 = vld [vmem:[%s1901_s4] ss:$0 sm:$0xff]  ;;  %s1697_s4 = smov [#allocation8]  }
 0x169   :  { %v627_v55 = vmax.f32 %v450_v47, 0.0  ;;  %v629_v56 = vmax.f32 %v563_v48, 0.0  ;;  %s1205_s8 = sshll.u32 %s1697_s4, 4  ;;  %s1206_s8 = int_to_ptr.vmem [resolvable:$true] %s1205_s8 }
 0x16a   :  { %v628_v58 = vmax.f32 %v452_v52, 0.0  ;;  %v630_v59 = vmax.f32 %v565_v53, 0.0  ;;  %s1661_s9 = scalar_lea.vmem %s1206_s8, 1024  ;;  %p1666_p11 = scmp.lt.s32.totalorder %s1206_s8, %s1206_s8 }
 0x16b   :  { %v659_v60 = vpack.c.bf16 %v627_v55, %v623_v54  ;;  %v661_v61 = vpack.c.bf16 %v629_v56, %v625_v46  ;;  %p1662_p10 = scmp.ne.s32.totalorder %s1206_s8, %s1661_s9  ;;  %p1667_p12 = scmp.lt.s32.totalorder %s1661_s9, %s1661_s9 }
 0x16c   :  { %v660_v16 = vpack.c.bf16 %v628_v58, %v624_v57  ;;  %v662_v62 = vpack.c.bf16 %v630_v59, %v626_v51 }
 0x16d   :  { %p1668_p13 = por %p1667_p12, %p1666_p11 }
 0x16e   :  { %1014 = vmatprep.mubr.bf16.mxu0 %v660_v16  ;;  %1111 = vmatprep.mubr.bf16.mxu1 %v662_v62 }
 0x16f   :  { %1015 = vmatmul.mubr.bf16.gmra.mrb[60].mxu0 %v659_v60  ;;  %1112 = vmatmul.mubr.bf16.gmra.mrb[60].mxu1 %v661_v61  ;;  %p1669_p0 = pnand %p1668_p13, %p1662_p10 }
 0x20a   :  { %v1386_v17 = vpop.f32.mrb[32].mxu0  ;;  %v1450_v63 = vpop.f32.mrb[32].mxu1 }
 0x20b   :  { %v1387_v19 = vpop.f32.mrb[33].mxu0  ;;  %v1451_v1 = vpop.f32.mrb[33].mxu1 }
 0x20c   :  { %v1388_v2 = vadd.f32 %v1387_v19, %v1386_v17  ;;  %v1452_v3 = vadd.f32 %v1451_v1, %v1450_v63  ;;  %v1389_v4 = vpop.f32.mrb[34].mxu0  ;;  %v1453_v5 = vpop.f32.mrb[34].mxu1 }
 0x20d   :  { %v1390_v6 = vpop.f32.mrb[35].mxu0  ;;  %v1454_v7 = vpop.f32.mrb[35].mxu1 }
 0x20e   :  { %v961_v8 = vadd.f32 %v1388_v2, %v1864_v18  ;;  %v1391_v9 = vadd.f32 %v1390_v6, %v1389_v4  ;;  %v1455_v10 = vadd.f32 %v1454_v7, %v1453_v5 }
 0x210   :  { %v1058_v11 = vadd.f32 %v1452_v3, %v961_v8  ;;  %v964_v12 = vadd.f32 %v1391_v9, %v1864_v18 }
 0x212   :  { %v1061_v13 = vadd.f32 %v1455_v10, %v964_v12  ;;  %v1392_v14 = vpop.f32.mrb[36].mxu0  ;;  %v1456_v0 = vpop.f32.mrb[36].mxu1 }
 0x213   :  { %v1393_v15 = vpop.f32.mrb[37].mxu0  ;;  %v1457_v20 = vpop.f32.mrb[37].mxu1 }
 0x214   :  { %v1326_v21 = vpack.c.bf16 %v1061_v13, %v1058_v11  ;;  %v1394_v22 = vadd.f32 %v1393_v15, %v1392_v14  ;;  %v1458_v23 = vadd.f32 %v1457_v20, %v1456_v0  ;;  %v1395_v24 = vpop.f32.mrb[38].mxu0  ;;  %v1459_v25 = vpop.f32.mrb[38].mxu1 }
 0x215   :  { %v1396_v26 = vpop.f32.mrb[39].mxu0  ;;  %v1460_v27 = vpop.f32.mrb[39].mxu1 }
 0x216   :  { %1327 = vst [vmem:[#allocation8] sm:$0xff] %v1326_v21   ;;  %v969_v28 = vadd.f32 %v1394_v22, %v1864_v18  ;;  %v1397_v29 = vadd.f32 %v1396_v26, %v1395_v24  ;;  %v1461_v30 = vadd.f32 %v1460_v27, %v1459_v25 }
 0x218   :  { %v1066_v31 = vadd.f32 %v1458_v23, %v969_v28  ;;  %v972_v32 = vadd.f32 %v1397_v29, %v1864_v18 }
 0x21a   :  { %v1069_v33 = vadd.f32 %v1461_v30, %v972_v32  ;;  %v1398_v34 = vpop.f32.mrb[40].mxu0  ;;  %v1462_v35 = vpop.f32.mrb[40].mxu1 }
 0x21b   :  { %v1399_v36 = vpop.f32.mrb[41].mxu0  ;;  %v1463_v37 = vpop.f32.mrb[41].mxu1 }
 0x21c   :  { %v1331_v38 = vpack.c.bf16 %v1069_v33, %v1066_v31  ;;  %v1400_v39 = vadd.f32 %v1399_v36, %v1398_v34  ;;  %v1464_v40 = vadd.f32 %v1463_v37, %v1462_v35  ;;  %v1401_v41 = vpop.f32.mrb[42].mxu0  ;;  %v1465_v42 = vpop.f32.mrb[42].mxu1 }
 0x21d   :  { %v1402_v43 = vpop.f32.mrb[43].mxu0  ;;  %v1466_v44 = vpop.f32.mrb[43].mxu1 }
 0x21e   :  { %1363 = vst [vmem:[#allocation8 + $0x8] sm:$0xff] %v1331_v38   ;;  %v977_v45 = vadd.f32 %v1400_v39, %v1864_v18  ;;  %v1403_v46 = vadd.f32 %v1402_v43, %v1401_v41  ;;  %v1467_v47 = vadd.f32 %v1466_v44, %v1465_v42 }
 0x220   :  { %v1074_v48 = vadd.f32 %v1464_v40, %v977_v45  ;;  %v980_v49 = vadd.f32 %v1403_v46, %v1864_v18 }
 0x222   :  { %v1077_v50 = vadd.f32 %v1467_v47, %v980_v49  ;;  %v1404_v51 = vpop.f32.mrb[44].mxu0  ;;  %v1468_v52 = vpop.f32.mrb[44].mxu1 }
 0x223   :  { %v1405_v53 = vpop.f32.mrb[45].mxu0  ;;  %v1469_v54 = vpop.f32.mrb[45].mxu1 }
 0x224   :  { %v1336_v55 = vpack.c.bf16 %v1077_v50, %v1074_v48  ;;  %v1406_v56 = vadd.f32 %v1405_v53, %v1404_v51  ;;  %v1470_v57 = vadd.f32 %v1469_v54, %v1468_v52  ;;  %v1407_v58 = vpop.f32.mrb[46].mxu0  ;;  %v1471_v59 = vpop.f32.mrb[46].mxu1 }
 0x225   :  { %v1408_v60 = vpop.f32.mrb[47].mxu0  ;;  %v1472_v61 = vpop.f32.mrb[47].mxu1 }
 0x226   :  { %1364 = vst [vmem:[#allocation8 + $0x10] sm:$0xff] %v1336_v55   ;;  %v985_v16 = vadd.f32 %v1406_v56, %v1864_v18  ;;  %v1409_v62 = vadd.f32 %v1408_v60, %v1407_v58  ;;  %v1473_v17 = vadd.f32 %v1472_v61, %v1471_v59 }
 0x228   :  { %v1082_v63 = vadd.f32 %v1470_v57, %v985_v16  ;;  %v988_v19 = vadd.f32 %v1409_v62, %v1864_v18 }
 0x22a   :  { %v1085_v1 = vadd.f32 %v1473_v17, %v988_v19  ;;  %v1410_v2 = vpop.f32.mrb[48].mxu0  ;;  %v1474_v3 = vpop.f32.mrb[48].mxu1 }
 0x22b   :  { %v1411_v4 = vpop.f32.mrb[49].mxu0  ;;  %v1475_v5 = vpop.f32.mrb[49].mxu1 }
 0x22c   :  { %v1341_v6 = vpack.c.bf16 %v1085_v1, %v1082_v63  ;;  %v1412_v7 = vadd.f32 %v1411_v4, %v1410_v2  ;;  %v1476_v8 = vadd.f32 %v1475_v5, %v1474_v3  ;;  %v1413_v9 = vpop.f32.mrb[50].mxu0  ;;  %v1477_v10 = vpop.f32.mrb[50].mxu1 }
 0x22d   :  { %v1414_v11 = vpop.f32.mrb[51].mxu0  ;;  %v1478_v12 = vpop.f32.mrb[51].mxu1 }
 0x22e   :  { %1365 = vst [vmem:[#allocation8 + $0x18] sm:$0xff] %v1341_v6   ;;  %v993_v13 = vadd.f32 %v1412_v7, %v1864_v18  ;;  %v1415_v14 = vadd.f32 %v1414_v11, %v1413_v9  ;;  %v1479_v0 = vadd.f32 %v1478_v12, %v1477_v10 }
 0x230   :  { %v1090_v15 = vadd.f32 %v1476_v8, %v993_v13  ;;  %v996_v20 = vadd.f32 %v1415_v14, %v1864_v18 }
 0x232   :  { %v1093_v21 = vadd.f32 %v1479_v0, %v996_v20  ;;  %v1416_v22 = vpop.f32.mrb[52].mxu0  ;;  %v1480_v23 = vpop.f32.mrb[52].mxu1 }
 0x233   :  { %v1417_v24 = vpop.f32.mrb[53].mxu0  ;;  %v1481_v25 = vpop.f32.mrb[53].mxu1 }
 0x234   :  { %v1346_v26 = vpack.c.bf16 %v1093_v21, %v1090_v15  ;;  %v1418_v27 = vadd.f32 %v1417_v24, %v1416_v22  ;;  %v1482_v28 = vadd.f32 %v1481_v25, %v1480_v23  ;;  %v1419_v29 = vpop.f32.mrb[54].mxu0  ;;  %v1483_v30 = vpop.f32.mrb[54].mxu1 }
 0x235   :  { %v1420_v31 = vpop.f32.mrb[55].mxu0  ;;  %v1484_v32 = vpop.f32.mrb[55].mxu1 }
 0x236   :  { %1366 = vst [vmem:[#allocation8 + $0x20] sm:$0xff] %v1346_v26   ;;  %v1001_v33 = vadd.f32 %v1418_v27, %v1864_v18  ;;  %v1421_v34 = vadd.f32 %v1420_v31, %v1419_v29  ;;  %v1485_v35 = vadd.f32 %v1484_v32, %v1483_v30 }
 0x238   :  { %v1098_v36 = vadd.f32 %v1482_v28, %v1001_v33  ;;  %v1004_v37 = vadd.f32 %v1421_v34, %v1864_v18 }
 0x23a   :  { %v1101_v38 = vadd.f32 %v1485_v35, %v1004_v37  ;;  %v1422_v39 = vpop.f32.mrb[56].mxu0  ;;  %v1486_v40 = vpop.f32.mrb[56].mxu1 }
 0x23b   :  { %v1423_v41 = vpop.f32.mrb[57].mxu0  ;;  %v1487_v42 = vpop.f32.mrb[57].mxu1 }
 0x23c   :  { %v1351_v43 = vpack.c.bf16 %v1101_v38, %v1098_v36  ;;  %v1424_v44 = vadd.f32 %v1423_v41, %v1422_v39  ;;  %v1488_v45 = vadd.f32 %v1487_v42, %v1486_v40  ;;  %v1425_v46 = vpop.f32.mrb[58].mxu0  ;;  %v1489_v47 = vpop.f32.mrb[58].mxu1 }
 0x23d   :  { %v1426_v48 = vpop.f32.mrb[59].mxu0  ;;  %v1490_v49 = vpop.f32.mrb[59].mxu1 }
 0x23e   :  { %1367 = vst [vmem:[#allocation8 + $0x28] sm:$0xff] %v1351_v43   ;;  %v1009_v50 = vadd.f32 %v1424_v44, %v1864_v18  ;;  %v1427_v51 = vadd.f32 %v1426_v48, %v1425_v46  ;;  %v1491_v52 = vadd.f32 %v1490_v49, %v1489_v47 }
 0x240   :  { %v1106_v53 = vadd.f32 %v1488_v45, %v1009_v50  ;;  %v1012_v54 = vadd.f32 %v1427_v51, %v1864_v18 }
 0x242   :  { %v1109_v55 = vadd.f32 %v1491_v52, %v1012_v54  ;;  %v1428_v56 = vpop.f32.mrb[60].mxu0  ;;  %v1492_v57 = vpop.f32.mrb[60].mxu1 }
 0x243   :  { %v1429_v58 = vpop.f32.mrb[61].mxu0  ;;  %v1493_v59 = vpop.f32.mrb[61].mxu1 }
 0x244   :  { %v1356_v60 = vpack.c.bf16 %v1109_v55, %v1106_v53  ;;  %v1430_v61 = vadd.f32 %v1429_v58, %v1428_v56  ;;  %v1494_v16 = vadd.f32 %v1493_v59, %v1492_v57  ;;  %v1431_v62 = vpop.f32.mrb[62].mxu0  ;;  %v1495_v17 = vpop.f32.mrb[62].mxu1 }
 0x245   :  { %v1432_v63 = vpop.f32.mrb[63].mxu0  ;;  %v1496_v19 = vpop.f32.mrb[63].mxu1 }
 0x246   :  { %1368 = vst [vmem:[#allocation8 + $0x30] sm:$0xff] %v1356_v60   ;;  %v1017_v1 = vadd.f32 %v1430_v61, %v1864_v18  ;;  %v1433_v2 = vadd.f32 %v1432_v63, %v1431_v62  ;;  %v1497_v3 = vadd.f32 %v1496_v19, %v1495_v17 }
 0x248   :  { %v1114_v4 = vadd.f32 %v1494_v16, %v1017_v1  ;;  %v1020_v5 = vadd.f32 %v1433_v2, %v1864_v18 }
 0x24a   :  { %v1117_v6 = vadd.f32 %v1497_v3, %v1020_v5 }
 0x24c   :  { %v1361_v7 = vpack.c.bf16 %v1117_v6, %v1114_v4 }
 0x24e   :  { %1369 = vst [vmem:[#allocation8 + $0x38] sm:$0xff] %v1361_v7  }
 0x24f   :  { %1672 = shalt.err (!%p1669_p0)
}
 0x250   :  { %s1673_s12 = scalar_lea.hbm %s1902_s5, 1024 }
 0x251   :  { %p1674_p1 = scmp.ne.s32.totalorder %s1902_s5, %s1673_s12  ;;  %p1677_p2 = scmp.lt.u32.totalorder %s1673_s12, %s1902_s5 }
 0x253   :  { %p1679_p3 = pnand %p1677_p2, %p1674_p1 }
 0x255   :  { %1682 = shalt.err (!%p1679_p3)
}
 0x256   :  { %1211 = dma.vmem_to_hbm [thread:$0]  %s1206_s8, 1024, %s1902_s5, [#allocation4], %s1693_s1, %s1693_s1, %s1694_s17  }
 0x257   :  { %1687 = dma.done.wait [#allocation4], 1024  }
 0x258   :  { %1688 = vsyncadd [#allocation4], 4294966272 }
 0x259   :  { %1215 = vsyncpa [#allocation3], 1 }
 0x25a   :  { %1216 = vsyncpa [#allocation6], 1 }
 0x25b   :  { %1217 = vsyncpa [#allocation4], 1 }

</bundles_post_ra>
